<compile_context>
chip_gen: v5e
topology: v5e:2x2
jax: 0.10.0
libtpu: 0.0.40
codegen_flags: <defaults>
</compile_context>

<pallas_src>
import functools

import jax
import jax.numpy as jnp
from jax.experimental import pallas as pl
from jax.experimental.pallas import tpu as pltpu


# ---------------------------------------------------------------------------
# Kernels
# ---------------------------------------------------------------------------

def _kernel_k_resident(*refs, fold_bias):
    """2-D grid (j over N outer, i over M inner): one full-K MXU pass/tile."""
    if fold_bias:
        x_ref, w_ref, bias_ref, acts_ref, pre_ref = refs
        xv = x_ref[...]
    else:
        x_ref, bpre_ref, w_ref, bias_ref, acts_ref, pre_ref = refs
        xv = x_ref[...] - bpre_ref[...]                     # (tm, K) - (1, K)
    pre = jnp.dot(xv, w_ref[...], preferred_element_type=jnp.float32)
    pre = pre + bias_ref[...]                               # (tm, tn) + (1, tn)
    pre_ref[...] = pre.astype(pre_ref.dtype)                # cache.acts
    acts_ref[...] = jnp.maximum(pre, 0.0).astype(acts_ref.dtype)


def _kernel_k_split(*refs, fold_bias):
    """3-D grid (j, i, k): (tm, tn) output tile reduced over the K axis."""
    if fold_bias:
        x_ref, w_ref, bias_ref, acts_ref, pre_ref, acc_ref = refs
        xv = x_ref[...]
    else:
        x_ref, bpre_ref, w_ref, bias_ref, acts_ref, pre_ref, acc_ref = refs
        xv = x_ref[...] - bpre_ref[...]                     # (tm, tk) - (1, tk)
    k = pl.program_id(2)
    prod = jnp.dot(xv, w_ref[...], preferred_element_type=jnp.float32)

    @pl.when(k == 0)
    def _():
        acc_ref[...] = prod                                 # no zero-fill + add

    @pl.when(k != 0)
    def _():
        acc_ref[...] += prod

    @pl.when(k == pl.num_programs(2) - 1)
    def _():
        pre = acc_ref[...] + bias_ref[...]
        pre_ref[...] = pre.astype(pre_ref.dtype)            # cache.acts
        acts_ref[...] = jnp.maximum(pre, 0.0).astype(acts_ref.dtype)


# ---------------------------------------------------------------------------
# Helpers
# ---------------------------------------------------------------------------

def _itemsize(dt):
    return jnp.dtype(dt).itemsize


def _pick_tile(dim, pref, align):
    """Largest multiple of `align` dividing `dim` and <= pref; else full dim."""
    pref = max(align, min(pref, dim))
    if dim % align == 0:
        t = (pref // align) * align
        while t >= align:
            if dim % t == 0:
                return t
            t -= align
    # Full-dim block is always legal regardless of (8, 128) alignment.
    return dim


def _vmem_capacity_bytes():
    try:
        info = pltpu.get_tpu_info()
        cap = getattr(info, "vmem_capacity_bytes", None)
        if cap:
            return int(cap)
    except Exception:
        pass
    return 64 * 1024 * 1024      # v7x-safe fallback; conservative on v5e/v6e


# ---------------------------------------------------------------------------
# Wrapper
# ---------------------------------------------------------------------------

def cache_proc_layer_forward(
    x, W, b_pre, b, *,
    tm=256, tn=512, tk=2048,
    compute_dtype=jnp.bfloat16,    # MXU operand dtype; use jnp.float32 to disable
    acts_dtype=None,               # default: x.dtype (exact module semantics)
    preacts_dtype=None,            # default: x.dtype; bf16 is an opt-in perf knob
    fold_bias=None,                # None -> auto (fold only when M amortizes it)
    vmem_budget_bytes=None,        # None -> 45% of chip VMEM capacity
):
    """Returns (acts, cache_acts) == (relu(preacts), preacts)."""
    M, K = x.shape
    K2, N = W.shape
    assert K == K2, "x / W inner dims must match"

    orig_dtype = x.dtype
    acts_dtype = orig_dtype if acts_dtype is None else acts_dtype
    preacts_dtype = orig_dtype if preacts_dtype is None else preacts_dtype
    compute_dtype = orig_dtype if compute_dtype is None else compute_dtype

    # Tiles: aligned divisors of the problem dims (fallback: full dim).
    tm = _pick_tile(M, tm, 8)
    tn = _pick_tile(N, tn, 128)
    tk = _pick_tile(K, tk, 128)

    if fold_bias is None:
        # Folding costs one extra full-W matvec read; only worth it when the
        # batch is large enough that W traffic is not the dominant term.
        fold_bias = (M // tm) >= 4

    # --- bias handling -----------------------------------------------------
    if fold_bias:
        # (x - b_pre) @ W + b == x @ W + (b - b_pre @ W); no f32 copy of W.
        bias_row = (b.reshape(1, N).astype(jnp.float32)
                    - jnp.dot(b_pre.reshape(1, K).astype(W.dtype), W,
                              preferred_element_type=jnp.float32))
        bpre_row = None
    else:
        bias_row = b.reshape(1, N).astype(jnp.float32)
        bpre_row = b_pre.reshape(1, K).astype(compute_dtype)

    x_c = x.astype(compute_dtype)
    W_c = W.astype(compute_dtype)

    in_size = _itemsize(compute_dtype)
    acts_size = _itemsize(acts_dtype)
    pre_size = _itemsize(preacts_dtype)

    # --- per-chip VMEM policy ----------------------------------------------
    vmem_cap = _vmem_capacity_bytes()
    if vmem_budget_bytes is None:
        vmem_budget_bytes = int(0.45 * vmem_cap)
    vmem_limit_ceiling = int(0.80 * vmem_cap)     # ~51 MiB v7x, ~102 MiB v5e/v6e

    out_bytes = 2 * tm * tn * (acts_size + pre_size)     # double-buffered outputs
    mxu_scratch = tm * tn * 4                            # Mosaic dot-result scratch

    # Estimated VMEM for the K-resident (2-D grid) variant, double-buffered.
    kres_bytes = (2 * tm * K * in_size                    # x tile
                  + 2 * K * tn * in_size                  # W tile
                  + (0 if fold_bias else 2 * K * in_size)  # b_pre row
                  + 2 * tn * 4                            # bias row tile
                  + out_bytes + mxu_scratch)
    k_resident = kres_bytes <= vmem_budget_bytes

    if k_resident:
        # Grid ordered (N, M): W block index depends only on the outer axis
        # -> W is read from HBM exactly once; x is the streamed operand.
        grid = (N // tn, M // tm)
        in_specs = [pl.BlockSpec((tm, K), lambda j, i: (i, 0))]     # x
        operands = [x_c]
        if not fold_bias:
            in_specs.append(pl.BlockSpec((1, K), lambda j, i: (0, 0)))  # b_pre
            operands.append(bpre_row)
        in_specs += [
            pl.BlockSpec((K, tn), lambda j, i: (0, j)),             # W (resident)
            pl.BlockSpec((1, tn), lambda j, i: (0, j)),             # bias row
        ]
        operands += [W_c, bias_row]
        out_specs = [
            pl.BlockSpec((tm, tn), lambda j, i: (i, j)),            # acts
            pl.BlockSpec((tm, tn), lambda j, i: (i, j)),            # preacts
        ]
        scratch_shapes = []
        kernel = functools.partial(_kernel_k_resident, fold_bias=fold_bias)
        dim_sem = ("parallel", "parallel")
        need_bytes = kres_bytes
    else:
        grid = (N // tn, M // tm, K // tk)
        in_specs = [pl.BlockSpec((tm, tk), lambda j, i, k: (i, k))]  # x
        operands = [x_c]
        if not fold_bias:
            in_specs.append(pl.BlockSpec((1, tk), lambda j, i, k: (0, k)))
            operands.append(bpre_row)
        in_specs += [
            pl.BlockSpec((tk, tn), lambda j, i, k: (k, j)),          # W
            pl.BlockSpec((1, tn), lambda j, i, k: (0, j)),           # bias row
        ]
        operands += [W_c, bias_row]
        out_specs = [
            pl.BlockSpec((tm, tn), lambda j, i, k: (i, j)),          # acts
            pl.BlockSpec((tm, tn), lambda j, i, k: (i, j)),          # preacts
        ]
        scratch_shapes = [pltpu.VMEM((tm, tn), jnp.float32)]
        kernel = functools.partial(_kernel_k_split, fold_bias=fold_bias)
        dim_sem = ("parallel", "parallel", "arbitrary")
        need_bytes = (2 * tm * tk * in_size
                      + 2 * tk * tn * in_size
                      + (0 if fold_bias else 2 * tk * in_size)
                      + 2 * tn * 4
                      + out_bytes
                      + tm * tn * 4          # accumulator scratch
                      + mxu_scratch)

    vmem_limit = int(min(max(int(1.5 * need_bytes), 32 * 1024 * 1024),
                         vmem_limit_ceiling))

    acts, preacts = pl.pallas_call(
        kernel,
        out_shape=(
            jax.ShapeDtypeStruct((M, N), acts_dtype),
            jax.ShapeDtypeStruct((M, N), preacts_dtype),
        ),
        grid_spec=pltpu.PrefetchScalarGridSpec(
            num_scalar_prefetch=0,
            grid=grid,
            in_specs=in_specs,
            out_specs=out_specs,
            scratch_shapes=scratch_shapes,
        ),
        compiler_params=pltpu.CompilerParams(
            dimension_semantics=dim_sem,
            vmem_limit_bytes=vmem_limit,
        ),
    )(*operands)

    # TODO(synk): train/eval `process_after_call` hook sets are empty by
    # default and have no numeric effect; not modeled beyond returning the
    # cached pre-activations (cache.acts).
    return acts, preacts


# ---------------------------------------------------------------------------
# Self-test
# ---------------------------------------------------------------------------

if __name__ == "__main__":
    key = jax.random.PRNGKey(0)
    k_x, k_w, k_bp, k_b = jax.random.split(key, 4)

    batch, d_in, d_out = 64, 256, 512

    x = jax.random.normal(k_x, (batch, d_in), dtype=jnp.float32)
    W = jax.random.normal(k_w, (d_in, d_out), dtype=jnp.float32) / jnp.sqrt(d_in)
    b_pre = 0.1 * jax.random.normal(k_bp, (d_in,), dtype=jnp.float32)
    b = 0.1 * jax.random.normal(k_b, (d_out,), dtype=jnp.float32)

    # Pure-JAX reference.
    pre_ref = (x - b_pre[None, :]) @ W + b[None, :]
    acts_ref = jnp.maximum(pre_ref, 0.0)

    # 1) Default path: bf16 MXU compute, K-resident 2-D grid, f32 outputs,
    #    auto (non-folded for this small batch) bias handling.
    acts, cache_acts = cache_proc_layer_forward(x, W, b_pre, b)
    acts = jax.block_until_ready(acts)
    cache_acts = jax.block_until_ready(cache_acts)
    assert acts.shape == (batch, d_out) and cache_acts.shape == (batch, d_out)
    assert jnp.allclose(acts, acts_ref, atol=6e-2, rtol=6e-2)
    assert jnp.allclose(cache_acts, pre_ref, atol=6e-2, rtol=6e-2)

    # 2) Exact f32 compute with the folded bias, K-resident path.
    acts_f, pre_f = cache_proc_layer_forward(
        x, W, b_pre, b, compute_dtype=jnp.float32, fold_bias=True)
    acts_f = jax.block_until_ready(acts_f)
    pre_f = jax.block_until_ready(pre_f)
    assert jnp.allclose(acts_f, acts_ref, atol=2e-3, rtol=2e-3)
    assert jnp.allclose(pre_f, pre_ref, atol=2e-3, rtol=2e-3)

    # 3) K-split (3-D grid) path, f32 compute, in-kernel b_pre subtract.
    acts_s, pre_s = cache_proc_layer_forward(
        x, W, b_pre, b, tk=128, compute_dtype=jnp.float32, fold_bias=False,
        vmem_budget_bytes=0)
    acts_s = jax.block_until_ready(acts_s)
    pre_s = jax.block_until_ready(pre_s)
    assert jnp.allclose(acts_s, acts_ref, atol=2e-3, rtol=2e-3)
    assert jnp.allclose(pre_s, pre_ref, atol=2e-3, rtol=2e-3)

    print("KERNEL_OK")
</pallas_src>

<mosaic_0001>
module attributes {stable_mosaic.version = 11 : i64} {
  func.func @_kernel_k_resident(%arg0: i32, %arg1: i32, %arg2: memref<64x256xbf16, #tpu.memory_space<vmem>>, %arg3: memref<1x256xbf16, #tpu.memory_space<vmem>>, %arg4: memref<256x512xbf16, #tpu.memory_space<vmem>>, %arg5: memref<1x512xf32, #tpu.memory_space<vmem>>, %arg6: memref<64x512xf32, #tpu.memory_space<vmem>>, %arg7: memref<64x512xf32, #tpu.memory_space<vmem>>) attributes {dimension_semantics = [#tpu.dimension_semantics<parallel>, #tpu.dimension_semantics<parallel>], iteration_bounds = array<i64: 1, 1>, scalar_prefetch = 0 : i64, scratch_operands = 0 : i64, tpu.core_type = #tpu.core_type<tc>, window_params = [{transform_indices = @transform_0, window_bounds = array<i64: 64, 256>}, {pipeline_mode = #tpu.pipeline_mode<synchronous>, transform_indices = @transform_1, window_bounds = array<i64: 1, 256>}, {transform_indices = @transform_2, window_bounds = array<i64: 256, 512>}, {transform_indices = @transform_3, window_bounds = array<i64: 1, 512>}, {transform_indices = @transform_4, window_bounds = array<i64: 64, 512>}, {transform_indices = @transform_5, window_bounds = array<i64: 64, 512>}]} {
    %c0 = arith.constant 0 : index
    %c0_0 = arith.constant 0 : index
    %0 = vector.load %arg2[%c0, %c0_0] : memref<64x256xbf16, #tpu.memory_space<vmem>>, vector<64x256xbf16>
    %c0_1 = arith.constant 0 : index
    %c0_2 = arith.constant 0 : index
    %1 = vector.load %arg3[%c0_1, %c0_2] : memref<1x256xbf16, #tpu.memory_space<vmem>>, vector<1x256xbf16>
    %2 = vector.broadcast %1 : vector<1x256xbf16> to vector<64x256xbf16>
    %3 = arith.subf %0, %2 : vector<64x256xbf16>
    %c0_3 = arith.constant 0 : index
    %c0_4 = arith.constant 0 : index
    %4 = vector.load %arg4[%c0_3, %c0_4] : memref<256x512xbf16, #tpu.memory_space<vmem>>, vector<256x512xbf16>
    %cst = arith.constant dense<0.000000e+00> : vector<64x512xf32>
    %5 = tpu.matmul %3, %4, %cst {dimension_numbers = #tpu.dot_dimension_numbers<[1], [0], [0], [1], [0, 0, 1, 1], [], []>} : vector<64x256xbf16>, vector<256x512xbf16>, vector<64x512xf32> -> vector<64x512xf32>
    %c0_5 = arith.constant 0 : index
    %c0_6 = arith.constant 0 : index
    %6 = vector.load %arg5[%c0_5, %c0_6] : memref<1x512xf32, #tpu.memory_space<vmem>>, vector<1x512xf32>
    %7 = vector.broadcast %6 : vector<1x512xf32> to vector<64x512xf32>
    %8 = arith.addf %5, %7 : vector<64x512xf32>
    %c0_7 = arith.constant 0 : index
    %c0_8 = arith.constant 0 : index
    %9 = vector.load %arg7[%c0_7, %c0_8] : memref<64x512xf32, #tpu.memory_space<vmem>>, vector<64x512xf32>
    tpu.vector_store %arg7[%c0_7, %c0_8], %8 {strides = array<i32>} : memref<64x512xf32, #tpu.memory_space<vmem>>, vector<64x512xf32>,
    %cst_9 = arith.constant 0.000000e+00 : f32
    %10 = vector.broadcast %cst_9 : f32 to vector<64x512xf32>
    %11 = arith.maximumf %8, %10 : vector<64x512xf32>
    %c0_10 = arith.constant 0 : index
    %c0_11 = arith.constant 0 : index
    %12 = vector.load %arg6[%c0_10, %c0_11] : memref<64x512xf32, #tpu.memory_space<vmem>>, vector<64x512xf32>
    tpu.vector_store %arg6[%c0_10, %c0_11], %11 {strides = array<i32>} : memref<64x512xf32, #tpu.memory_space<vmem>>, vector<64x512xf32>,
    return
  }
  func.func @transform_0(%arg0: i32, %arg1: i32) -> (i32, i32) {
    %c0_i32 = arith.constant 0 : i32
    %c0_i32_0 = arith.constant 0 : i32
    return %arg1, %c0_i32 : i32, i32
  }
  func.func @transform_1(%arg0: i32, %arg1: i32) -> (i32, i32) {
    %c0_i32 = arith.constant 0 : i32
    %c0_i32_0 = arith.constant 0 : i32
    %c0_i32_1 = arith.constant 0 : i32
    return %c0_i32, %c0_i32_0 : i32, i32
  }
  func.func @transform_2(%arg0: i32, %arg1: i32) -> (i32, i32) {
    %c0_i32 = arith.constant 0 : i32
    %c0_i32_0 = arith.constant 0 : i32
    return %c0_i32, %arg0 : i32, i32
  }
  func.func @transform_3(%arg0: i32, %arg1: i32) -> (i32, i32) {
    %c0_i32 = arith.constant 0 : i32
    %c0_i32_0 = arith.constant 0 : i32
    return %c0_i32, %arg0 : i32, i32
  }
  func.func @transform_4(%arg0: i32, %arg1: i32) -> (i32, i32) {
    %c0_i32 = arith.constant 0 : i32
    return %arg1, %arg0 : i32, i32
  }
  func.func @transform_5(%arg0: i32, %arg1: i32) -> (i32, i32) {
    %c0_i32 = arith.constant 0 : i32
    return %arg1, %arg0 : i32, i32
  }
}

</mosaic_0001>

<bundles_post_ra>
// kernel: tpu_custom_call.1
= control target key start
LH: loop header
LB: loop body
LE: loop exit
PB: predicated region body
PF: predicated region fallthrough
CT: control target
= control target key end

     0   :  { %11 = vsyncpa [#allocation3], 0  ;;  %s1538_s0 = inlined_call_operand.hbm [shape: bf16[64,256], index: 0, kind: input, shape index: {}]   ;;  %s1539_s1 = inlined_call_operand.hbm [shape: bf16[1,256], index: 1, kind: input, shape index: {}]   ;;  %s1540_s2 = inlined_call_operand.hbm [shape: bf16[256,512], index: 2, kind: input, shape index: {}]   ;;  %s1541_s3 = inlined_call_operand.hbm [shape: f32[1,512], index: 3, kind: input, shape index: {}]   ;;  %s1542_s4 = inlined_call_operand.hbm [shape: f32[64,512], index: 4, kind: output, shape index: {0}]   ;;  %s1543_s5 = inlined_call_operand.hbm [shape: f32[64,512], index: 5, kind: output, shape index: {1}]  }
   0x1   :  { %12 = vsyncpa [#allocation6], 0 }
   0x2   :  { %13 = vsyncpa [#allocation9], 0 }
   0x3   :  { %14 = vsyncpa [#allocation4], 0  ;;  %s34_s20 = sshll.u32 %s1539_s1, 4  ;;  %s35_s20 = int_to_ptr.hbm [resolvable:$true] %s34_s20 }
   0x4   :  { %15 = vsyncpa [#allocation12], 0  ;;  %s1388_s21 = smov [#allocation5]   ;;  %s20_s25 = sshll.u32 %s1538_s0, 4  ;;  %s21_s25 = int_to_ptr.hbm [resolvable:$true] %s20_s25 }
   0x5   :  { %s36_s22 = sshll.u32 %s1388_s21, 4  ;;  %s1389_s26 = smov [#allocation2]   ;;  %s37_s22 = int_to_ptr.vmem [resolvable:$true] %s36_s22 }
   0x6   :  { %39 = dma.hbm_to_vmem [thread:$0]  %s35_s20, 32, %s37_s22, [#allocation6]  }
   0x7   :  { %s22_s27 = sshll.u32 %s1389_s26, 4  ;;  %s1390_s28 = smov 128   ;;  %s23_s27 = int_to_ptr.vmem [resolvable:$true] %s22_s27 }
   0x8   :  { %s1391_s29 = smov 8   ;;  %s44_s1 = sshll.u32 %s1540_s2, 4  ;;  %s45_s1 = int_to_ptr.hbm [resolvable:$true] %s44_s1 }
   0x9   :  { %28 = dma.hbm_to_vmem [thread:$0]  %s21_s25, 1024, %s23_s27, [#allocation3], %s1390_s28, %s1390_s28, %s1391_s29  }
   0xa   :  { %s1392_s7 = smov [#allocation7]   ;;  %s58_s0 = sshll.u32 %s1541_s3, 4  ;;  %s59_s0 = int_to_ptr.hbm [resolvable:$true] %s58_s0 }
   0xb   :  { %s46_s8 = sshll.u32 %s1392_s7, 4  ;;  %s1393_s11 = smov 256   ;;  %s47_s8 = int_to_ptr.vmem [resolvable:$true] %s46_s8 }
   0xc   :  { %s1394_s12 = smov 16   ;;  %s1395_s13 = smov [#allocation8]  }
   0xd   :  { %52 = dma.hbm_to_vmem [thread:$0]  %s45_s1, 8192, %s47_s8, [#allocation6], %s1393_s11, %s1393_s11, %s1394_s12  }
   0xe   :  { %s60_s14 = sshll.u32 %s1395_s13, 4  ;;  %s61_s14 = int_to_ptr.vmem [resolvable:$true] %s60_s14 }
   0xf   :  { %63 = dma.hbm_to_vmem [thread:$0]  %s59_s0, 64, %s61_s14, [#allocation9]  }
  0x10   :  { %1378 = dma.done.wait [#allocation3], 1024  }
  0x11   :  { %1379 = vsyncadd [#allocation3], 4294966272 }
  0x12   :  { %1380 = dma.done.wait [#allocation6], 8224  }
  0x13   :  { %1381 = vsyncadd [#allocation6], 4294959072 }
  0x14   :  { %1382 = dma.done.wait [#allocation9], 64  }
  0x15   :  { %1383 = vsyncadd [#allocation9], 4294967232  ;;  %v1016_v0 = vld [vmem:[#allocation7 + $0xe0] sm:$0xf]  ;;  %v1188_v1 = vld [vmem:[#allocation7 + $0xec] sm:$0xf0] }
  0x16   :  { %v1144_v2 = vld [vmem:[#allocation7 + $0x1e0] sm:$0xf]  ;;  %v1017_v3 = vor.u32 %v1188_v1, %v1016_v0  ;;  %v1220_v4 = vld [vmem:[#allocation7 + $0x1ec] sm:$0xf0]  ;;  %v1186_v5 = vld [vmem:[#allocation7 + $0xe4] sm:$0xf] }
  0x17   :  { %v1018_v6 = vld [vmem:[#allocation7 + $0xf0] sm:$0xf0]  ;;  %v1145_v7 = vor.u32 %v1220_v4, %v1144_v2  ;;  %v1218_v9 = vld [vmem:[#allocation7 + $0x1e4] sm:$0xf]  ;;  %v1000_v11 = vld [vmem:[#allocation7 + $0xc0] sm:$0xf] }
  0x18   :  { %v1021_v8 = vor.u32 %v1186_v5, %v1018_v6  ;;  %v1146_v10 = vld [vmem:[#allocation7 + $0x1f0] sm:$0xf0]  ;;  %535 = vmatpush.bf16.msra.mxu0 %v1017_v3  ;;  %v1184_v13 = vld [vmem:[#allocation7 + $0xcc] sm:$0xf0]  ;;  %v1128_v14 = vld [vmem:[#allocation7 + $0x1c0] sm:$0xf] }
  0x19   :  { %v1149_v12 = vor.u32 %v1218_v9, %v1146_v10  ;;  %v1216_v15 = vld [vmem:[#allocation7 + $0x1cc] sm:$0xf0]  ;;  %564 = vmatpush.bf16.msra.mxu1 %v1145_v7  ;;  %v1001_v16 = vor.u32 %v1184_v13, %v1000_v11  ;;  %v1182_v18 = vld [vmem:[#allocation7 + $0xc4] sm:$0xf]  ;;  %v1002_v19 = vld [vmem:[#allocation7 + $0xd0] sm:$0xf0] }
  0x1a   :  { %593 = vmatpush.bf16.msra.mxu2 %v1021_v8  ;;  %v1129_v17 = vor.u32 %v1216_v15, %v1128_v14  ;;  %v1214_v20 = vld [vmem:[#allocation7 + $0x1c4] sm:$0xf]  ;;  %v1005_v21 = vor.u32 %v1182_v18, %v1002_v19  ;;  %v1130_v22 = vld [vmem:[#allocation7 + $0x1d0] sm:$0xf0]  ;;  %v984_v23 = vld [vmem:[#allocation7 + $0xa0] sm:$0xf] }
  0x1b   :  { %622 = vmatpush.bf16.msra.mxu3 %v1149_v12  ;;  %v1180_v24 = vld [vmem:[#allocation7 + $0xac] sm:$0xf0]  ;;  %v1133_v25 = vor.u32 %v1214_v20, %v1130_v22  ;;  %v1112_v26 = vld [vmem:[#allocation7 + $0x1a0] sm:$0xf]  ;;  %v1178_v28 = vld [vmem:[#allocation7 + $0xa4] sm:$0xf] }
  0x1c   :  { %v1212_v27 = vld [vmem:[#allocation7 + $0x1ac] sm:$0xf0]  ;;  %536 = vmatpush.bf16.msra.mxu0 %v1001_v16  ;;  %v985_v29 = vor.u32 %v1180_v24, %v984_v23  ;;  %v986_v30 = vld [vmem:[#allocation7 + $0xb0] sm:$0xf0]  ;;  %v1210_v31 = vld [vmem:[#allocation7 + $0x1a4] sm:$0xf] }
  0x1d   :  { %v1114_v32 = vld [vmem:[#allocation7 + $0x1b0] sm:$0xf0]  ;;  %565 = vmatpush.bf16.msra.mxu1 %v1129_v17  ;;  %v1113_v33 = vor.u32 %v1212_v27, %v1112_v26  ;;  %v989_v34 = vor.u32 %v1178_v28, %v986_v30  ;;  %v968_v35 = vld [vmem:[#allocation7 + $0x80] sm:$0xf]  ;;  %v1176_v36 = vld [vmem:[#allocation7 + $0x8c] sm:$0xf0] }
  0x1e   :  { %594 = vmatpush.bf16.msra.mxu2 %v1005_v21  ;;  %v1096_v37 = vld [vmem:[#allocation7 + $0x180] sm:$0xf]  ;;  %v1117_v38 = vor.u32 %v1210_v31, %v1114_v32  ;;  %v1208_v39 = vld [vmem:[#allocation7 + $0x18c] sm:$0xf0]  ;;  %v1174_v40 = vld [vmem:[#allocation7 + $0x84] sm:$0xf]  ;;  %v969_v44 = vor.u32 %v1176_v36, %v968_v35 }
  0x1f   :  { %623 = vmatpush.bf16.msra.mxu3 %v1133_v25  ;;  %v970_v41 = vld [vmem:[#allocation7 + $0x90] sm:$0xf0]  ;;  %v1206_v42 = vld [vmem:[#allocation7 + $0x184] sm:$0xf]  ;;  %v1097_v45 = vor.u32 %v1208_v39, %v1096_v37  ;;  %v952_v47 = vld [vmem:[#allocation7 + $0x60] sm:$0xf] }
  0x20   :  { %v1098_v43 = vld [vmem:[#allocation7 + $0x190] sm:$0xf0]  ;;  %537 = vmatpush.bf16.msra.mxu0 %v985_v29  ;;  %v973_v46 = vor.u32 %v1174_v40, %v970_v41  ;;  %v1172_v48 = vld [vmem:[#allocation7 + $0x6c] sm:$0xf0]  ;;  %v1080_v49 = vld [vmem:[#allocation7 + $0x160] sm:$0xf] }
  0x21   :  { %566 = vmatpush.bf16.msra.mxu1 %v1113_v33  ;;  %v1101_v50 = vor.u32 %v1206_v42, %v1098_v43  ;;  %v1204_v51 = vld [vmem:[#allocation7 + $0x16c] sm:$0xf0]  ;;  %v1170_v52 = vld [vmem:[#allocation7 + $0x64] sm:$0xf]  ;;  %v954_v53 = vld [vmem:[#allocation7 + $0x70] sm:$0xf0]  ;;  %v953_v56 = vor.u32 %v1172_v48, %v952_v47 }
  0x22   :  { %595 = vmatpush.bf16.msra.mxu2 %v989_v34  ;;  %v1202_v54 = vld [vmem:[#allocation7 + $0x164] sm:$0xf]  ;;  %v1082_v55 = vld [vmem:[#allocation7 + $0x170] sm:$0xf0]  ;;  %v1081_v57 = vor.u32 %v1204_v51, %v1080_v49  ;;  %v957_v58 = vor.u32 %v1170_v52, %v954_v53  ;;  %v936_v59 = vld [vmem:[#allocation7 + $0x40] sm:$0xf] }
  0x23   :  { %624 = vmatpush.bf16.msra.mxu3 %v1117_v38  ;;  %v1168_v60 = vld [vmem:[#allocation7 + $0x4c] sm:$0xf0]  ;;  %v1064_v61 = vld [vmem:[#allocation7 + $0x140] sm:$0xf]  ;;  %v1085_v62 = vor.u32 %v1202_v54, %v1082_v55  ;;  %v1166_v0 = vld [vmem:[#allocation7 + $0x44] sm:$0xf] }
  0x24   :  { %538 = vmatpush.bf16.msra.mxu0 %v969_v44  ;;  %v1200_v63 = vld [vmem:[#allocation7 + $0x14c] sm:$0xf0]  ;;  %v938_v1 = vld [vmem:[#allocation7 + $0x50] sm:$0xf0]  ;;  %v1198_v2 = vld [vmem:[#allocation7 + $0x144] sm:$0xf]  ;;  %v937_v4 = vor.u32 %v1168_v60, %v936_v59 }
  0x25   :  { %567 = vmatpush.bf16.msra.mxu1 %v1097_v45  ;;  %v1066_v3 = vld [vmem:[#allocation7 + $0x150] sm:$0xf0]  ;;  %v1065_v5 = vor.u32 %v1200_v63, %v1064_v61  ;;  %v941_v6 = vor.u32 %v1166_v0, %v938_v1  ;;  %v920_v7 = vld [vmem:[#allocation7 + $0x20] sm:$0xf]  ;;  %v1164_v8 = vld [vmem:[#allocation7 + $0x2c] sm:$0xf0] }
  0x26   :  { %596 = vmatpush.bf16.msra.mxu2 %v973_v46  ;;  %v1048_v9 = vld [vmem:[#allocation7 + $0x120] sm:$0xf]  ;;  %v1069_v10 = vor.u32 %v1198_v2, %v1066_v3  ;;  %v1196_v11 = vld [vmem:[#allocation7 + $0x12c] sm:$0xf0]  ;;  %v1162_v12 = vld [vmem:[#allocation7 + $0x24] sm:$0xf]  ;;  %v921_v17 = vor.u32 %v1164_v8, %v920_v7 }
  0x27   :  { %625 = vmatpush.bf16.msra.mxu3 %v1101_v50  ;;  %v922_v13 = vld [vmem:[#allocation7 + $0x30] sm:$0xf0]  ;;  %v1194_v14 = vld [vmem:[#allocation7 + $0x124] sm:$0xf]  ;;  %v88_v16 = vld [vmem:[#allocation5] sm:$0x3]  ;;  %v1049_v20 = vor.u32 %v1196_v11, %v1048_v9 }
  0x28   :  { %539 = vmatpush.bf16.msra.mxu0 %v953_v56  ;;  %v1050_v15 = vld [vmem:[#allocation7 + $0x130] sm:$0xf0]  ;;  %v904_v18 = vld [vmem:[#allocation7] sm:$0xf]  ;;  %v1160_v19 = vld [vmem:[#allocation7 + $0xc] sm:$0xf0]  ;;  %v925_v21 = vor.u32 %v1162_v12, %v922_v13 }
  0x29   :  { %568 = vmatpush.bf16.msra.mxu1 %v1081_v57  ;;  %90 = vst [vmem:[#allocation1] ss:$9 sm:$0xff] %v88_v16  ;;  %v1032_v22 = vld [vmem:[#allocation7 + $0x100] sm:$0xf]  ;;  %v1192_v23 = vld [vmem:[#allocation7 + $0x10c] sm:$0xf0]  ;;  %v1053_v25 = vor.u32 %v1194_v14, %v1050_v15  ;;  %v905_v32 = vor.u32 %v1160_v19, %v904_v18 }
  0x2a   :  { %597 = vmatpush.bf16.msra.mxu2 %v957_v58  ;;  %v1158_v24 = vld [vmem:[#allocation7 + $0x4] sm:$0xf]  ;;  %v906_v26 = vld [vmem:[#allocation7 + $0x10] sm:$0xf0]  ;;  %v1187_v29 = vld [vmem:[#allocation7 + $0xec] sm:$0xf]  ;;  %v1033_v36 = vor.u32 %v1192_v23, %v1032_v22 }
  0x2b   :  { %626 = vmatpush.bf16.msra.mxu3 %v1085_v62  ;;  %v1190_v27 = vld [vmem:[#allocation7 + $0x104] sm:$0xf]  ;;  %v1034_v28 = vld [vmem:[#allocation7 + $0x110] sm:$0xf0]  ;;  %v1026_v30 = vld [vmem:[#allocation7 + $0xf8] sm:$0xf0]  ;;  %v909_v37 = vor.u32 %v1158_v24, %v906_v26 }
  0x2c   :  { %540 = vmatpush.bf16.msra.mxu0 %v937_v4  ;;  %v1219_v31 = vld [vmem:[#allocation7 + $0x1ec] sm:$0xf]  ;;  %v1154_v33 = vld [vmem:[#allocation7 + $0x1f8] sm:$0xf0]  ;;  %v1024_v34 = vld [vmem:[#allocation7 + $0xe8] sm:$0xf]  ;;  %v1037_v41 = vor.u32 %v1190_v27, %v1034_v28  ;;  %v1029_v43 = vor.u32 %v1187_v29, %v1026_v30 }
  0x2d   :  { %569 = vmatpush.bf16.msra.mxu1 %v1065_v5  ;;  %v1189_v35 = vld [vmem:[#allocation7 + $0xf4] sm:$0xf0]  ;;  %v80_v38 = vld [vmem:[#allocation2] sm:$0xff]  ;;  %v1152_v39 = vld [vmem:[#allocation7 + $0x1e8] sm:$0xf]  ;;  %v1157_v48 = vor.u32 %v1219_v31, %v1154_v33  ;;  %s1396_s2 = smov [#allocation11]  }
  0x2e   :  { %598 = vmatpush.bf16.msra.mxu2 %v941_v6  ;;  %v1221_v40 = vld [vmem:[#allocation7 + $0x1f4] sm:$0xf0]  ;;  %v81_v42 = vld [vmem:[#allocation2 + $0x8] sm:$0xff]  ;;  %v1010_v45 = vld [vmem:[#allocation7 + $0xd8] sm:$0xf0]  ;;  %v1025_v49 = vor.u32 %v1189_v35, %v1024_v34  ;;  %v99_v57 = vunpack.c.l.bf16 %v80_v38  ;;  %v100_v59 = vunpack.c.h.bf16 %v80_v38  ;;  %s880_s3 = sshll.u32 %s1396_s2, 4  ;;  %s881_s3 = int_to_ptr.vmem [resolvable:$true] %s880_s3 }
  0x2f   :  { %627 = vmatpush.bf16.msra.mxu3 %v1069_v10  ;;  %v1183_v44 = vld [vmem:[#allocation7 + $0xcc] sm:$0xf]  ;;  %v1153_v53 = vor.u32 %v1221_v40, %v1152_v39  ;;  %v1138_v54 = vld [vmem:[#allocation7 + $0x1d8] sm:$0xf0]  ;;  %v1008_v55 = vld [vmem:[#allocation7 + $0xc8] sm:$0xf]  ;;  %v101_v58 = vunpack.c.l.bf16 %v81_v42  ;;  %v102_v0 = vunpack.c.h.bf16 %v81_v42 }
  0x30   :  { %541 = vmatpush.bf16.msra.mxu0 %v921_v17  ;;  %v91_v46 = vld [vmem:[#allocation1] sm:$0xff]  ;;  %v92_v47 = vld [vmem:[#allocation1 + $0x9] sm:$0xff]  ;;  %v1215_v50 = vld [vmem:[#allocation7 + $0x1cc] sm:$0xf]  ;;  %v1013_v1 = vor.u32 %v1183_v44, %v1010_v45  ;;  %s882_s17 = sshll.u32 %s1543_s5, 4  ;;  %s1397_s18 = smov [#allocation10]   ;;  %s883_s17 = int_to_ptr.hbm [resolvable:$true] %s882_s17 }
  0x31   :  { %570 = vmatpush.bf16.msra.mxu1 %v1049_v20  ;;  %v93_v51 = vpack.i.b16 %v91_v46, %v91_v46  ;;  %v96_v52 = vpack.i.b16 %v92_v47, %v92_v47  ;;  %v1185_v56 = vld [vmem:[#allocation7 + $0xd4] sm:$0xf0]  ;;  %v1136_v60 = vld [vmem:[#allocation7 + $0x1c8] sm:$0xf]  ;;  %v1141_v2 = vor.u32 %v1215_v50, %v1138_v54  ;;  %v1179_v7 = vld [vmem:[#allocation7 + $0xac] sm:$0xf] }
  0x32   :  { %599 = vmatpush.bf16.msra.mxu2 %v925_v21  ;;  %v1217_v61 = vld [vmem:[#allocation7 + $0x1d4] sm:$0xf0]  ;;  %v1009_v3 = vor.u32 %v1185_v56, %v1008_v55  ;;  %v994_v8 = vld [vmem:[#allocation7 + $0xb8] sm:$0xf0]  ;;  %v1211_v9 = vld [vmem:[#allocation7 + $0x1ac] sm:$0xf] }
  0x33   :  { %628 = vmatpush.bf16.msra.mxu3 %v1053_v25  ;;  %v95_v62 = vperm.slane %v93_v51, 0  ;;  %v98_v63 = vperm.slane %v96_v52, 0  ;;  %v1137_v6 = vor.u32 %v1217_v61, %v1136_v60  ;;  %v1122_v10 = vld [vmem:[#allocation7 + $0x1b8] sm:$0xf0]  ;;  %v992_v11 = vld [vmem:[#allocation7 + $0xa8] sm:$0xf]  ;;  %v997_v21 = vor.u32 %v1179_v7, %v994_v8 }
  0x34   :  { %542 = vmatpush.bf16.msra.mxu0 %v905_v32  ;;  %v1181_v16 = vld [vmem:[#allocation7 + $0xb4] sm:$0xf0]  ;;  %v1120_v17 = vld [vmem:[#allocation7 + $0x1a8] sm:$0xf]  ;;  %v1125_v22 = vor.u32 %v1211_v9, %v1122_v10  ;;  %v1175_v23 = vld [vmem:[#allocation7 + $0x8c] sm:$0xf] }
  0x35   :  { %571 = vmatpush.bf16.msra.mxu1 %v1033_v36  ;;  %v1442_v4 = vunpack.c.l.bf16 %v95_v62  ;;  %v1444_v5 = vunpack.c.l.bf16 %v98_v63  ;;  %v1213_v18 = vld [vmem:[#allocation7 + $0x1b4] sm:$0xf0]  ;;  %v993_v24 = vor.u32 %v1181_v16, %v992_v11  ;;  %v978_v26 = vld [vmem:[#allocation7 + $0x98] sm:$0xf0]  ;;  %v1207_v27 = vld [vmem:[#allocation7 + $0x18c] sm:$0xf] }
  0x36   :  { %600 = vmatpush.bf16.msra.mxu2 %v909_v37  ;;  %v1121_v25 = vor.u32 %v1213_v18, %v1120_v17  ;;  %v1106_v28 = vld [vmem:[#allocation7 + $0x198] sm:$0xf0]  ;;  %v82_v29 = vld [vmem:[#allocation2 + $0x10] sm:$0xff]  ;;  %v976_v30 = vld [vmem:[#allocation7 + $0x88] sm:$0xf]  ;;  %v981_v35 = vor.u32 %v1175_v23, %v978_v26  ;;  %s867_s19 = sshll.u32 %s1397_s18, 4  ;;  %s868_s19 = int_to_ptr.vmem [resolvable:$true] %s867_s19 }
  0x37   :  { %629 = vmatpush.bf16.msra.mxu3 %v1037_v41  ;;  %v117_v12 = vsub.f32 %v99_v57, %v1442_v4  ;;  %v119_v13 = vsub.f32 %v101_v58, %v1442_v4  ;;  %v118_v14 = vsub.f32 %v100_v59, %v1444_v5  ;;  %v120_v15 = vsub.f32 %v102_v0, %v1444_v5  ;;  %v1177_v31 = vld [vmem:[#allocation7 + $0x94] sm:$0xf0]  ;;  %v1104_v33 = vld [vmem:[#allocation7 + $0x188] sm:$0xf]  ;;  %v1171_v37 = vld [vmem:[#allocation7 + $0x6c] sm:$0xf] }
  0x38   :  { %651 = vmatpush.bf16.msrb.mxu0 %v1025_v49  ;;  %v83_v32 = vld [vmem:[#allocation2 + $0x18] sm:$0xff]  ;;  %v1109_v36 = vor.u32 %v1207_v27, %v1106_v28  ;;  %v977_v39 = vor.u32 %v1177_v31, %v976_v30  ;;  %v1203_v41 = vld [vmem:[#allocation7 + $0x16c] sm:$0xf]  ;;  %v103_v44 = vunpack.c.l.bf16 %v82_v29  ;;  %v104_v46 = vunpack.c.h.bf16 %v82_v29  ;;  %v1088_v49 = vld [vmem:[#allocation7 + $0x168] sm:$0xf]  ;;  %s869_s22 = sshll.u32 %s1542_s4, 4  ;;  %s870_s22 = int_to_ptr.hbm [resolvable:$true] %s869_s22 }
  0x39   :  { %680 = vmatpush.bf16.msrb.mxu1 %v1153_v53  ;;  %v1450_v19 = vpack.c.bf16 %v119_v13, %v117_v12  ;;  %v1452_v20 = vpack.c.bf16 %v120_v15, %v118_v14  ;;  %v1209_v34 = vld [vmem:[#allocation7 + $0x194] sm:$0xf0]  ;;  %v962_v38 = vld [vmem:[#allocation7 + $0x78] sm:$0xf0]  ;;  %v105_v45 = vunpack.c.l.bf16 %v83_v32  ;;  %v106_v47 = vunpack.c.h.bf16 %v83_v32  ;;  %v1167_v53 = vld [vmem:[#allocation7 + $0x4c] sm:$0xf] }
  0x3a   :  { %709 = vmatpush.bf16.msrb.mxu2 %v1029_v43  ;;  %v1105_v40 = vor.u32 %v1209_v34, %v1104_v33  ;;  %v1090_v42 = vld [vmem:[#allocation7 + $0x178] sm:$0xf0]  ;;  %v960_v43 = vld [vmem:[#allocation7 + $0x68] sm:$0xf]  ;;  %v1205_v50 = vld [vmem:[#allocation7 + $0x174] sm:$0xf0]  ;;  %v965_v51 = vor.u32 %v1171_v37, %v962_v38  ;;  %v121_v59 = vsub.f32 %v103_v44, %v1442_v4  ;;  %v122_v61 = vsub.f32 %v104_v46, %v1444_v5 }
  0x3b   :  { %738 = vmatpush.bf16.msrb.mxu3 %v1157_v48  ;;  %543 = vmatmul.bf16.vlgmr.msra.gmra.mxu0 %v1450_v19  ;;  %v1173_v48 = vld [vmem:[#allocation7 + $0x74] sm:$0xf0]  ;;  %v1093_v52 = vor.u32 %v1203_v41, %v1090_v42  ;;  %v1089_v55 = vor.u32 %v1205_v50, %v1088_v49  ;;  %v946_v56 = vld [vmem:[#allocation7 + $0x58] sm:$0xf0]  ;;  %v1199_v57 = vld [vmem:[#allocation7 + $0x14c] sm:$0xf]  ;;  %v123_v60 = vsub.f32 %v105_v45, %v1442_v4 }
  0x3c   :  { %652 = vmatpush.bf16.msrb.mxu0 %v1009_v3  ;;  %572 = vmatmul.bf16.vlgmr.msra.gmra.mxu1 %v1452_v20  ;;  %v961_v54 = vor.u32 %v1173_v48, %v960_v43  ;;  %v1074_v58 = vld [vmem:[#allocation7 + $0x158] sm:$0xf0]  ;;  %v124_v62 = vsub.f32 %v106_v47, %v1444_v5  ;;  %v944_v63 = vld [vmem:[#allocation7 + $0x48] sm:$0xf]  ;;  %v1169_v0 = vld [vmem:[#allocation7 + $0x54] sm:$0xf0] }
  0x3d   :  { %681 = vmatpush.bf16.msrb.mxu1 %v1137_v6  ;;  %601 = vmatmul.bf16.vlgmr.msra.gmra.mxu2 %v1450_v19  ;;  %v945_v3 = vor.u32 %v1169_v0, %v944_v63  ;;  %v1462_v6 = vpack.c.bf16 %v123_v60, %v121_v59  ;;  %v84_v8 = vld [vmem:[#allocation2 + $0x20] sm:$0xff]  ;;  %v85_v9 = vld [vmem:[#allocation2 + $0x28] sm:$0xff]  ;;  %v1201_v11 = vld [vmem:[#allocation7 + $0x154] sm:$0xf0]  ;;  %s1398_s23 = smov 512   ;;  %s1399_s24 = smov 32  }
  0x3e   :  { %710 = vmatpush.bf16.msrb.mxu2 %v1013_v1  ;;  %630 = vmatmul.bf16.vlgmr.msra.gmra.mxu3 %v1452_v20  ;;  %v949_v1 = vor.u32 %v1167_v53, %v946_v56  ;;  %v1464_v7 = vpack.c.bf16 %v124_v62, %v122_v61  ;;  %v1072_v10 = vld [vmem:[#allocation7 + $0x148] sm:$0xf]  ;;  %v1163_v12 = vld [vmem:[#allocation7 + $0x2c] sm:$0xf]  ;;  %v930_v14 = vld [vmem:[#allocation7 + $0x38] sm:$0xf0]  ;;  %v107_v17 = vunpack.c.l.bf16 %v84_v8  ;;  %v108_v26 = vunpack.c.h.bf16 %v84_v8 }
  0x3f   :  { %739 = vmatpush.bf16.msrb.mxu3 %v1141_v2  ;;  %v1077_v2 = vor.u32 %v1199_v57, %v1074_v58  ;;  %v1073_v13 = vor.u32 %v1201_v11, %v1072_v10  ;;  %v1195_v15 = vld [vmem:[#allocation7 + $0x12c] sm:$0xf]  ;;  %v1058_v16 = vld [vmem:[#allocation7 + $0x138] sm:$0xf0]  ;;  %v933_v18 = vor.u32 %v1163_v12, %v930_v14  ;;  %v1165_v23 = vld [vmem:[#allocation7 + $0x34] sm:$0xf0]  ;;  %v110_v27 = vunpack.c.h.bf16 %v85_v9 }
  0x40   :  { %653 = vmatpush.bf16.msrb.mxu0 %v993_v24  ;;  %v1056_v24 = vld [vmem:[#allocation7 + $0x128] sm:$0xf]  ;;  %v1197_v29 = vld [vmem:[#allocation7 + $0x134] sm:$0xf0]  ;;  %v1159_v30 = vld [vmem:[#allocation7 + $0xc] sm:$0xf]  ;;  %v125_v41 = vsub.f32 %v107_v17, %v1442_v4  ;;  %v126_v44 = vsub.f32 %v108_v26, %v1444_v5 }
  0x41   :  { %682 = vmatpush.bf16.msrb.mxu1 %v1121_v25  ;;  %v109_v25 = vunpack.c.l.bf16 %v85_v9  ;;  %v914_v31 = vld [vmem:[#allocation7 + $0x18] sm:$0xf0]  ;;  %v1057_v32 = vor.u32 %v1197_v29, %v1056_v24  ;;  %v1191_v34 = vld [vmem:[#allocation7 + $0x10c] sm:$0xf]  ;;  %v1161_v38 = vld [vmem:[#allocation7 + $0x14] sm:$0xf0]  ;;  %v128_v45 = vsub.f32 %v110_v27, %v1444_v5 }
  0x42   :  { %711 = vmatpush.bf16.msrb.mxu2 %v997_v21  ;;  %v1061_v21 = vor.u32 %v1195_v15, %v1058_v16  ;;  %v917_v33 = vor.u32 %v1159_v30, %v914_v31  ;;  %v86_v49 = vld [vmem:[#allocation2 + $0x30] sm:$0xff]  ;;  %v87_v50 = vld [vmem:[#allocation2 + $0x38] sm:$0xff] }
  0x43   :  { %740 = vmatpush.bf16.msrb.mxu3 %v1125_v22  ;;  %v928_v22 = vld [vmem:[#allocation7 + $0x28] sm:$0xf]  ;;  %v127_v43 = vsub.f32 %v109_v25, %v1442_v4  ;;  %v138_v48 = vpack.c.bf16 %v128_v45, %v126_v44  ;;  %v112_v53 = vunpack.c.h.bf16 %v86_v49 }
  0x44   :  { %654 = vmatpush.bf16.msrb.mxu0 %v977_v39  ;;  %v929_v28 = vor.u32 %v1165_v23, %v928_v22  ;;  %v1040_v39 = vld [vmem:[#allocation7 + $0x108] sm:$0xf] }
  0x45   :  { %683 = vmatpush.bf16.msrb.mxu1 %v1105_v40  ;;  %v1193_v40 = vld [vmem:[#allocation7 + $0x114] sm:$0xf0]  ;;  %v137_v47 = vpack.c.bf16 %v127_v43, %v125_v41  ;;  %v130_v57 = vsub.f32 %v112_v53, %v1444_v5 }
  0x46   :  { %712 = vmatpush.bf16.msrb.mxu2 %v981_v35  ;;  %v1042_v35 = vld [vmem:[#allocation7 + $0x118] sm:$0xf0]  ;;  %v1041_v46 = vor.u32 %v1193_v40, %v1040_v39 }
  0x47   :  { %741 = vmatpush.bf16.msrb.mxu3 %v1109_v36  ;;  %v912_v36 = vld [vmem:[#allocation7 + $0x8] sm:$0xf]  ;;  %v1045_v37 = vor.u32 %v1191_v34, %v1042_v35 }
  0x48   :  { %655 = vmatpush.bf16.msrb.mxu0 %v961_v54  ;;  %v913_v42 = vor.u32 %v1161_v38, %v912_v36  ;;  %v114_v54 = vunpack.c.h.bf16 %v87_v50 }
  0x49   :  { %684 = vmatpush.bf16.msrb.mxu1 %v1089_v55 }
  0x4a   :  { %713 = vmatpush.bf16.msrb.mxu2 %v965_v51  ;;  %v111_v51 = vunpack.c.l.bf16 %v86_v49  ;;  %v132_v58 = vsub.f32 %v114_v54, %v1444_v5 }
  0x4b   :  { %742 = vmatpush.bf16.msrb.mxu3 %v1093_v52  ;;  %548 = vmatmul.bf16.gmra.mxu0 %v1462_v6  ;;  %v113_v52 = vunpack.c.l.bf16 %v87_v50 }
  0x4c   :  { %656 = vmatpush.bf16.msrb.mxu0 %v945_v3  ;;  %577 = vmatmul.bf16.gmra.mxu1 %v1464_v7  ;;  %v129_v55 = vsub.f32 %v111_v51, %v1442_v4  ;;  %v140_v60 = vpack.c.bf16 %v132_v58, %v130_v57 }
  0x4d   :  { %606 = vmatmul.bf16.gmra.mxu2 %v1462_v6  ;;  %685 = vmatpush.bf16.msrb.mxu1 %v1073_v13  ;;  %v131_v56 = vsub.f32 %v113_v52, %v1442_v4  ;;  %v1486_v4 = vld [vmem:[#allocation8] sm:$0xf] }
  0x4e   :  { %714 = vmatpush.bf16.msrb.mxu2 %v949_v1  ;;  %635 = vmatmul.bf16.gmra.mxu3 %v1464_v7  ;;  %v1489_v5 = vperm.slane %v1486_v4, 0  ;;  %v1493_v63 = vperm.slane %v1486_v4, 1 }
  0x4f   :  { %743 = vmatpush.bf16.msrb.mxu3 %v1077_v2  ;;  %v139_v59 = vpack.c.bf16 %v131_v56, %v129_v55 }
  0x50   :  { %657 = vmatpush.bf16.msrb.mxu0 %v929_v28 }
  0x51   :  { %686 = vmatpush.bf16.msrb.mxu1 %v1057_v32 }
  0x52   :  { %715 = vmatpush.bf16.msrb.mxu2 %v933_v18 }
  0x53   :  { %744 = vmatpush.bf16.msrb.mxu3 %v1061_v21 }
  0x54   :  { %658 = vmatpush.bf16.msrb.mxu0 %v913_v42 }
  0x55   :  { %687 = vmatpush.bf16.msrb.mxu1 %v1041_v46 }
  0x56   :  { %716 = vmatpush.bf16.msrb.mxu2 %v917_v33 }
  0x57   :  { %745 = vmatpush.bf16.msrb.mxu3 %v1045_v37 }
  0x5b   :  { %553 = vmatmul.bf16.gmra.mxu0 %v137_v47 }
  0x5c   :  { %582 = vmatmul.bf16.gmra.mxu1 %v138_v48 }
  0x5d   :  { %611 = vmatmul.bf16.gmra.mxu2 %v137_v47 }
  0x5e   :  { %640 = vmatmul.bf16.gmra.mxu3 %v138_v48 }
  0x6b   :  { %558 = vmatmul.bf16.gmra.mxu0 %v139_v59 }
  0x6c   :  { %587 = vmatmul.bf16.gmra.mxu1 %v140_v60 }
  0x6d   :  { %616 = vmatmul.bf16.gmra.mxu2 %v139_v59 }
  0x6e   :  { %645 = vmatmul.bf16.gmra.mxu3 %v140_v60 }
  0x7b   :  { %659 = vmatmul.bf16.vlgmr.msrb.gmra.mxu0 %v1450_v19 }
  0x7c   :  { %688 = vmatmul.bf16.vlgmr.msrb.gmra.mxu1 %v1452_v20 }
  0x7d   :  { %717 = vmatmul.bf16.vlgmr.msrb.gmra.mxu2 %v1450_v19 }
  0x7e   :  { %746 = vmatmul.bf16.vlgmr.msrb.gmra.mxu3 %v1452_v20 }
  0x8b   :  { %664 = vmatmul.bf16.gmra.mxu0 %v1462_v6 }
  0x8c   :  { %693 = vmatmul.bf16.gmra.mxu1 %v1464_v7 }
  0x8d   :  { %722 = vmatmul.bf16.gmra.mxu2 %v1462_v6 }
  0x8e   :  { %751 = vmatmul.bf16.gmra.mxu3 %v1464_v7 }
  0x9b   :  { %669 = vmatmul.bf16.gmra.mxu0 %v137_v47 }
  0x9c   :  { %698 = vmatmul.bf16.gmra.mxu1 %v138_v48 }
  0x9d   :  { %727 = vmatmul.bf16.gmra.mxu2 %v137_v47 }
  0x9e   :  { %756 = vmatmul.bf16.gmra.mxu3 %v138_v48 }
  0xab   :  { %674 = vmatmul.bf16.gmra.mxu0 %v139_v59 }
  0xac   :  { %703 = vmatmul.bf16.gmra.mxu1 %v140_v60 }
  0xad   :  { %732 = vmatmul.bf16.gmra.mxu2 %v139_v59 }
  0xae   :  { %761 = vmatmul.bf16.gmra.mxu3 %v140_v60 }
  0xb8   :  { %v544_v19 = vpop.f32.mrf.mxu0 }
  0xb9   :  { %v573_v20 = vpop.f32.mrf.mxu1  ;;  %v545_v61 = vadd.f32 %v544_v19, %v1489_v5 }
  0xbb   :  { %v574_v62 = vadd.f32 %v573_v20, %v545_v61 }
  0xbd   :  { %767 = vst [vmem:[#allocation11] sm:$0xff] %v574_v62  ;;  %v799_v0 = vmax.f32 %v574_v62, 0.0 }
  0xbf   :  { %831 = vst [vmem:[#allocation10] sm:$0xff] %v799_v0 }
  0xc0   :  { %v602_v1 = vpop.f32.mrf.mxu2  ;;  %v546_v6 = vpop.f32.mrf.mxu0 }
  0xc1   :  { %v631_v2 = vpop.f32.mrf.mxu3  ;;  %v603_v3 = vadd.f32 %v602_v1, %v1493_v63  ;;  %v575_v7 = vpop.f32.mrf.mxu1  ;;  %v547_v8 = vadd.f32 %v546_v6, %v1489_v5 }
  0xc3   :  { %v632_v9 = vadd.f32 %v631_v2, %v603_v3  ;;  %v576_v10 = vadd.f32 %v575_v7, %v547_v8 }
  0xc5   :  { %768 = vst [vmem:[#allocation11 + $0x8] sm:$0xff] %v632_v9  ;;  %v800_v11 = vmax.f32 %v632_v9, 0.0  ;;  %v803_v12 = vmax.f32 %v576_v10, 0.0 }
  0xc6   :  { %771 = vst [vmem:[#allocation11 + $0x20] sm:$0xff] %v576_v10 }
  0xc7   :  { %832 = vst [vmem:[#allocation10 + $0x8] sm:$0xff] %v800_v11 }
  0xc8   :  { %835 = vst [vmem:[#allocation10 + $0x20] sm:$0xff] %v803_v12  ;;  %v604_v13 = vpop.f32.mrf.mxu2  ;;  %v549_v16 = vpop.f32.mrf.mxu0  ;;  %v1510_v12 = vperm.slane %v1486_v4, 2 }
  0xc9   :  { %v633_v14 = vpop.f32.mrf.mxu3  ;;  %v605_v15 = vadd.f32 %v604_v13, %v1493_v63  ;;  %v578_v17 = vpop.f32.mrf.mxu1  ;;  %v550_v18 = vadd.f32 %v549_v16, %v1489_v5 }
  0xcb   :  { %v634_v21 = vadd.f32 %v633_v14, %v605_v15  ;;  %v579_v22 = vadd.f32 %v578_v17, %v550_v18 }
  0xcd   :  { %772 = vst [vmem:[#allocation11 + $0x28] sm:$0xff] %v634_v21  ;;  %v804_v23 = vmax.f32 %v634_v21, 0.0  ;;  %v807_v24 = vmax.f32 %v579_v22, 0.0 }
  0xce   :  { %775 = vst [vmem:[#allocation11 + $0x40] sm:$0xff] %v579_v22 }
  0xcf   :  { %836 = vst [vmem:[#allocation10 + $0x28] sm:$0xff] %v804_v23  ;;  %v1515_v23 = vperm.slane %v1486_v4, 3 }
  0xd0   :  { %839 = vst [vmem:[#allocation10 + $0x40] sm:$0xff] %v807_v24  ;;  %v607_v25 = vpop.f32.mrf.mxu2  ;;  %v551_v28 = vpop.f32.mrf.mxu0 }
  0xd1   :  { %v636_v26 = vpop.f32.mrf.mxu3  ;;  %v608_v27 = vadd.f32 %v607_v25, %v1493_v63  ;;  %v580_v29 = vpop.f32.mrf.mxu1  ;;  %v552_v30 = vadd.f32 %v551_v28, %v1489_v5 }
  0xd3   :  { %v637_v31 = vadd.f32 %v636_v26, %v608_v27  ;;  %v581_v32 = vadd.f32 %v580_v29, %v552_v30 }
  0xd5   :  { %776 = vst [vmem:[#allocation11 + $0x48] sm:$0xff] %v637_v31  ;;  %v808_v33 = vmax.f32 %v637_v31, 0.0  ;;  %v811_v34 = vmax.f32 %v581_v32, 0.0 }
  0xd6   :  { %779 = vst [vmem:[#allocation11 + $0x60] sm:$0xff] %v581_v32 }
  0xd7   :  { %840 = vst [vmem:[#allocation10 + $0x48] sm:$0xff] %v808_v33 }
  0xd8   :  { %843 = vst [vmem:[#allocation10 + $0x60] sm:$0xff] %v811_v34  ;;  %v609_v35 = vpop.f32.mrf.mxu2  ;;  %v554_v38 = vpop.f32.mrf.mxu0 }
  0xd9   :  { %v638_v36 = vpop.f32.mrf.mxu3  ;;  %v610_v37 = vadd.f32 %v609_v35, %v1493_v63  ;;  %v583_v39 = vpop.f32.mrf.mxu1  ;;  %v555_v40 = vadd.f32 %v554_v38, %v1489_v5 }
  0xdb   :  { %v639_v41 = vadd.f32 %v638_v36, %v610_v37  ;;  %v584_v42 = vadd.f32 %v583_v39, %v555_v40 }
  0xdd   :  { %780 = vst [vmem:[#allocation11 + $0x68] sm:$0xff] %v639_v41  ;;  %v812_v43 = vmax.f32 %v639_v41, 0.0  ;;  %v815_v44 = vmax.f32 %v584_v42, 0.0 }
  0xde   :  { %783 = vst [vmem:[#allocation11 + $0x80] sm:$0xff] %v584_v42 }
  0xdf   :  { %844 = vst [vmem:[#allocation10 + $0x68] sm:$0xff] %v812_v43 }
  0xe0   :  { %847 = vst [vmem:[#allocation10 + $0x80] sm:$0xff] %v815_v44  ;;  %v612_v45 = vpop.f32.mrf.mxu2  ;;  %v556_v48 = vpop.f32.mrf.mxu0 }
  0xe1   :  { %v641_v46 = vpop.f32.mrf.mxu3  ;;  %v613_v47 = vadd.f32 %v612_v45, %v1493_v63  ;;  %v585_v49 = vpop.f32.mrf.mxu1  ;;  %v557_v50 = vadd.f32 %v556_v48, %v1489_v5 }
  0xe3   :  { %v642_v51 = vadd.f32 %v641_v46, %v613_v47  ;;  %v586_v52 = vadd.f32 %v585_v49, %v557_v50 }
  0xe5   :  { %784 = vst [vmem:[#allocation11 + $0x88] sm:$0xff] %v642_v51  ;;  %v816_v53 = vmax.f32 %v642_v51, 0.0  ;;  %v819_v54 = vmax.f32 %v586_v52, 0.0 }
  0xe6   :  { %787 = vst [vmem:[#allocation11 + $0xa0] sm:$0xff] %v586_v52 }
  0xe7   :  { %848 = vst [vmem:[#allocation10 + $0x88] sm:$0xff] %v816_v53 }
  0xe8   :  { %851 = vst [vmem:[#allocation10 + $0xa0] sm:$0xff] %v819_v54  ;;  %v614_v55 = vpop.f32.mrf.mxu2  ;;  %v559_v58 = vpop.f32.mrf.mxu0 }
  0xe9   :  { %v643_v56 = vpop.f32.mrf.mxu3  ;;  %v615_v57 = vadd.f32 %v614_v55, %v1493_v63  ;;  %v588_v59 = vpop.f32.mrf.mxu1  ;;  %v560_v60 = vadd.f32 %v559_v58, %v1489_v5 }
  0xeb   :  { %v644_v19 = vadd.f32 %v643_v56, %v615_v57  ;;  %v589_v20 = vadd.f32 %v588_v59, %v560_v60 }
  0xed   :  { %788 = vst [vmem:[#allocation11 + $0xa8] sm:$0xff] %v644_v19  ;;  %v820_v61 = vmax.f32 %v644_v19, 0.0  ;;  %v823_v62 = vmax.f32 %v589_v20, 0.0 }
  0xee   :  { %791 = vst [vmem:[#allocation11 + $0xc0] sm:$0xff] %v589_v20 }
  0xef   :  { %852 = vst [vmem:[#allocation10 + $0xa8] sm:$0xff] %v820_v61 }
  0xf0   :  { %855 = vst [vmem:[#allocation10 + $0xc0] sm:$0xff] %v823_v62  ;;  %v617_v0 = vpop.f32.mrf.mxu2  ;;  %v561_v3 = vpop.f32.mrf.mxu0 }
  0xf1   :  { %v646_v1 = vpop.f32.mrf.mxu3  ;;  %v618_v2 = vadd.f32 %v617_v0, %v1493_v63  ;;  %v590_v6 = vpop.f32.mrf.mxu1  ;;  %v562_v7 = vadd.f32 %v561_v3, %v1489_v5 }
  0xf3   :  { %v647_v8 = vadd.f32 %v646_v1, %v618_v2  ;;  %v591_v9 = vadd.f32 %v590_v6, %v562_v7 }
  0xf5   :  { %792 = vst [vmem:[#allocation11 + $0xc8] sm:$0xff] %v647_v8  ;;  %v824_v10 = vmax.f32 %v647_v8, 0.0  ;;  %v827_v11 = vmax.f32 %v591_v9, 0.0 }
  0xf6   :  { %795 = vst [vmem:[#allocation11 + $0xe0] sm:$0xff] %v591_v9 }
  0xf7   :  { %856 = vst [vmem:[#allocation10 + $0xc8] sm:$0xff] %v824_v10 }
  0xf8   :  { %859 = vst [vmem:[#allocation10 + $0xe0] sm:$0xff] %v827_v11  ;;  %v619_v13 = vpop.f32.mrf.mxu2  ;;  %v660_v16 = vpop.f32.mrf.mxu0 }
  0xf9   :  { %v648_v14 = vpop.f32.mrf.mxu3  ;;  %v620_v15 = vadd.f32 %v619_v13, %v1493_v63  ;;  %v689_v17 = vpop.f32.mrf.mxu1  ;;  %v661_v18 = vadd.f32 %v660_v16, %v1510_v12 }
  0xfb   :  { %v649_v5 = vadd.f32 %v648_v14, %v620_v15  ;;  %v690_v21 = vadd.f32 %v689_v17, %v661_v18 }
  0xfd   :  { %796 = vst [vmem:[#allocation11 + $0xe8] sm:$0xff] %v649_v5  ;;  %v828_v22 = vmax.f32 %v649_v5, 0.0  ;;  %v801_v24 = vmax.f32 %v690_v21, 0.0 }
  0xfe   :  { %769 = vst [vmem:[#allocation11 + $0x10] sm:$0xff] %v690_v21 }
  0xff   :  { %860 = vst [vmem:[#allocation10 + $0xe8] sm:$0xff] %v828_v22 }
 0x100   :  { %833 = vst [vmem:[#allocation10 + $0x10] sm:$0xff] %v801_v24  ;;  %v718_v25 = vpop.f32.mrf.mxu2  ;;  %v662_v63 = vpop.f32.mrf.mxu0 }
 0x101   :  { %v747_v26 = vpop.f32.mrf.mxu3  ;;  %v719_v27 = vadd.f32 %v718_v25, %v1515_v23  ;;  %v691_v28 = vpop.f32.mrf.mxu1  ;;  %v663_v29 = vadd.f32 %v662_v63, %v1510_v12 }
 0x103   :  { %v748_v30 = vadd.f32 %v747_v26, %v719_v27  ;;  %v692_v31 = vadd.f32 %v691_v28, %v663_v29 }
 0x105   :  { %770 = vst [vmem:[#allocation11 + $0x18] sm:$0xff] %v748_v30  ;;  %v802_v32 = vmax.f32 %v748_v30, 0.0  ;;  %v805_v33 = vmax.f32 %v692_v31, 0.0 }
 0x106   :  { %773 = vst [vmem:[#allocation11 + $0x30] sm:$0xff] %v692_v31 }
 0x107   :  { %834 = vst [vmem:[#allocation10 + $0x18] sm:$0xff] %v802_v32 }
 0x108   :  { %837 = vst [vmem:[#allocation10 + $0x30] sm:$0xff] %v805_v33  ;;  %v720_v4 = vpop.f32.mrf.mxu2  ;;  %v665_v36 = vpop.f32.mrf.mxu0 }
 0x109   :  { %v749_v34 = vpop.f32.mrf.mxu3  ;;  %v721_v35 = vadd.f32 %v720_v4, %v1515_v23  ;;  %v694_v37 = vpop.f32.mrf.mxu1  ;;  %v666_v38 = vadd.f32 %v665_v36, %v1510_v12 }
 0x10b   :  { %v750_v39 = vadd.f32 %v749_v34, %v721_v35  ;;  %v695_v40 = vadd.f32 %v694_v37, %v666_v38 }
 0x10d   :  { %774 = vst [vmem:[#allocation11 + $0x38] sm:$0xff] %v750_v39  ;;  %v806_v41 = vmax.f32 %v750_v39, 0.0  ;;  %v809_v42 = vmax.f32 %v695_v40, 0.0 }
 0x10e   :  { %777 = vst [vmem:[#allocation11 + $0x50] sm:$0xff] %v695_v40 }
 0x10f   :  { %838 = vst [vmem:[#allocation10 + $0x38] sm:$0xff] %v806_v41 }
 0x110   :  { %841 = vst [vmem:[#allocation10 + $0x50] sm:$0xff] %v809_v42  ;;  %v723_v43 = vpop.f32.mrf.mxu2  ;;  %v667_v46 = vpop.f32.mrf.mxu0 }
 0x111   :  { %v752_v44 = vpop.f32.mrf.mxu3  ;;  %v724_v45 = vadd.f32 %v723_v43, %v1515_v23  ;;  %v696_v47 = vpop.f32.mrf.mxu1  ;;  %v668_v48 = vadd.f32 %v667_v46, %v1510_v12 }
 0x113   :  { %v753_v49 = vadd.f32 %v752_v44, %v724_v45  ;;  %v697_v50 = vadd.f32 %v696_v47, %v668_v48 }
 0x115   :  { %778 = vst [vmem:[#allocation11 + $0x58] sm:$0xff] %v753_v49  ;;  %v810_v51 = vmax.f32 %v753_v49, 0.0  ;;  %v813_v52 = vmax.f32 %v697_v50, 0.0 }
 0x116   :  { %781 = vst [vmem:[#allocation11 + $0x70] sm:$0xff] %v697_v50 }
 0x117   :  { %842 = vst [vmem:[#allocation10 + $0x58] sm:$0xff] %v810_v51 }
 0x118   :  { %845 = vst [vmem:[#allocation10 + $0x70] sm:$0xff] %v813_v52  ;;  %v725_v53 = vpop.f32.mrf.mxu2  ;;  %v670_v56 = vpop.f32.mrf.mxu0 }
 0x119   :  { %v754_v54 = vpop.f32.mrf.mxu3  ;;  %v726_v55 = vadd.f32 %v725_v53, %v1515_v23  ;;  %v699_v57 = vpop.f32.mrf.mxu1  ;;  %v671_v58 = vadd.f32 %v670_v56, %v1510_v12 }
 0x11b   :  { %v755_v59 = vadd.f32 %v754_v54, %v726_v55  ;;  %v700_v60 = vadd.f32 %v699_v57, %v671_v58 }
 0x11d   :  { %782 = vst [vmem:[#allocation11 + $0x78] sm:$0xff] %v755_v59  ;;  %v814_v19 = vmax.f32 %v755_v59, 0.0  ;;  %v817_v20 = vmax.f32 %v700_v60, 0.0 }
 0x11e   :  { %785 = vst [vmem:[#allocation11 + $0x90] sm:$0xff] %v700_v60 }
 0x11f   :  { %846 = vst [vmem:[#allocation10 + $0x78] sm:$0xff] %v814_v19 }
 0x120   :  { %849 = vst [vmem:[#allocation10 + $0x90] sm:$0xff] %v817_v20  ;;  %v728_v61 = vpop.f32.mrf.mxu2  ;;  %v672_v1 = vpop.f32.mrf.mxu0 }
 0x121   :  { %v757_v62 = vpop.f32.mrf.mxu3  ;;  %v729_v0 = vadd.f32 %v728_v61, %v1515_v23  ;;  %v701_v2 = vpop.f32.mrf.mxu1  ;;  %v673_v3 = vadd.f32 %v672_v1, %v1510_v12 }
 0x123   :  { %v758_v6 = vadd.f32 %v757_v62, %v729_v0  ;;  %v702_v7 = vadd.f32 %v701_v2, %v673_v3 }
 0x125   :  { %786 = vst [vmem:[#allocation11 + $0x98] sm:$0xff] %v758_v6  ;;  %v818_v8 = vmax.f32 %v758_v6, 0.0  ;;  %v821_v9 = vmax.f32 %v702_v7, 0.0 }
 0x126   :  { %789 = vst [vmem:[#allocation11 + $0xb0] sm:$0xff] %v702_v7 }
 0x127   :  { %850 = vst [vmem:[#allocation10 + $0x98] sm:$0xff] %v818_v8 }
 0x128   :  { %853 = vst [vmem:[#allocation10 + $0xb0] sm:$0xff] %v821_v9  ;;  %v730_v10 = vpop.f32.mrf.mxu2  ;;  %v675_v14 = vpop.f32.mrf.mxu0 }
 0x129   :  { %v759_v11 = vpop.f32.mrf.mxu3  ;;  %v731_v13 = vadd.f32 %v730_v10, %v1515_v23  ;;  %v704_v15 = vpop.f32.mrf.mxu1  ;;  %v676_v16 = vadd.f32 %v675_v14, %v1510_v12 }
 0x12b   :  { %v760_v17 = vadd.f32 %v759_v11, %v731_v13  ;;  %v705_v18 = vadd.f32 %v704_v15, %v676_v16 }
 0x12d   :  { %790 = vst [vmem:[#allocation11 + $0xb8] sm:$0xff] %v760_v17  ;;  %v822_v5 = vmax.f32 %v760_v17, 0.0  ;;  %v825_v21 = vmax.f32 %v705_v18, 0.0 }
 0x12e   :  { %793 = vst [vmem:[#allocation11 + $0xd0] sm:$0xff] %v705_v18 }
 0x12f   :  { %854 = vst [vmem:[#allocation10 + $0xb8] sm:$0xff] %v822_v5 }
 0x130   :  { %857 = vst [vmem:[#allocation10 + $0xd0] sm:$0xff] %v825_v21  ;;  %v733_v22 = vpop.f32.mrf.mxu2  ;;  %v677_v26 = vpop.f32.mrf.mxu0 }
 0x131   :  { %v762_v24 = vpop.f32.mrf.mxu3  ;;  %v734_v25 = vadd.f32 %v733_v22, %v1515_v23  ;;  %v678_v27 = vadd.f32 %v677_v26, %v1510_v12  ;;  %v706_v28 = vpop.f32.mrf.mxu1 }
 0x133   :  { %v763_v63 = vadd.f32 %v762_v24, %v734_v25  ;;  %v707_v29 = vadd.f32 %v706_v28, %v678_v27 }
 0x135   :  { %794 = vst [vmem:[#allocation11 + $0xd8] sm:$0xff] %v763_v63  ;;  %v826_v30 = vmax.f32 %v763_v63, 0.0  ;;  %v829_v31 = vmax.f32 %v707_v29, 0.0 }
 0x136   :  { %797 = vst [vmem:[#allocation11 + $0xf0] sm:$0xff] %v707_v29 }
 0x137   :  { %858 = vst [vmem:[#allocation10 + $0xd8] sm:$0xff] %v826_v30 }
 0x138   :  { %861 = vst [vmem:[#allocation10 + $0xf0] sm:$0xff] %v829_v31  ;;  %v735_v32 = vpop.f32.mrf.mxu2 }
 0x139   :  { %v736_v33 = vadd.f32 %v735_v32, %v1515_v23  ;;  %v764_v12 = vpop.f32.mrf.mxu3 }
 0x13b   :  { %v765_v4 = vadd.f32 %v764_v12, %v736_v33 }
 0x13d   :  { %798 = vst [vmem:[#allocation11 + $0xf8] sm:$0xff] %v765_v4  ;;  %v830_v34 = vmax.f32 %v765_v4, 0.0 }
 0x13e   :  { %888 = dma.vmem_to_hbm [thread:$0]  %s881_s3, 4096, %s883_s17, [#allocation12], %s1398_s23, %s1398_s23, %s1399_s24  }
 0x13f   :  { %862 = vst [vmem:[#allocation10 + $0xf8] sm:$0xff] %v830_v34 }
 0x140   :  { %875 = dma.vmem_to_hbm [thread:$0]  %s868_s19, 4096, %s870_s22, [#allocation4], %s1398_s23, %s1398_s23, %s1399_s24  }
 0x141   :  { %1384 = dma.done.wait [#allocation4], 4096  }
 0x142   :  { %1385 = vsyncadd [#allocation4], 4294963200 }
 0x143   :  { %1386 = dma.done.wait [#allocation12], 4096  }
 0x144   :  { %1387 = vsyncadd [#allocation12], 4294963200 }
 0x145   :  { %897 = vsyncpa [#allocation3], 1 }
 0x146   :  { %898 = vsyncpa [#allocation6], 1 }
 0x147   :  { %899 = vsyncpa [#allocation9], 1 }
 0x148   :  { %900 = vsyncpa [#allocation4], 1 }
 0x149   :  { %901 = vsyncpa [#allocation12], 1 }

</bundles_post_ra>
